<compile_context>
chip_gen: v5e
topology: v5e:2x2
jax: 0.10.0
libtpu: 0.0.40
codegen_flags: <defaults>
</compile_context>

<pallas_src>
import jax
import jax.numpy as jnp
from jax.experimental import pallas as pl
from jax.experimental.pallas import tpu as pltpu

STRUCTURE = [3, 50, 50, 1]
DEFAULT_TILE_B = 16384          # lane tile; amortizes per-grid-step overhead
VMEM_LIMIT_BYTES = 40 * 1024 * 1024   # > v5e 16MiB default scope, < v7x 64MiB physical


def _round_up(n, m):
    return ((n + m - 1) // m) * m


def mlp_kernel(xT_ref, w1_ref, b1_ref, w2_ref, b2_ref, w3c_ref, b3_ref, o_ref):
    xT = xT_ref[...]                                  # (IN, TILE_B) f32, batch on lanes
    w1 = w1_ref[...]                                  # (H1, IN) f32
    in_dim = w1.shape[1]

    # Layer 1: K = 3 is tiny -> exact f32 VPU broadcast multiply-adds (MXU not worth it).
    h1 = w1[:, 0:1] * xT[0:1, :]
    for k in range(1, in_dim):                        # static, unrolled (IN == 3)
        h1 = h1 + w1[:, k:k + 1] * xT[k:k + 1, :]
    h1 = jnp.maximum(h1 + b1_ref[...], 0.0)           # (H1, TILE_B) f32

    # Layer 2: 50x50 -> single-pass bf16 MXU matmul, f32 accumulation.
    # w2_ref is pre-cast to bf16 on the host (intentional numeric contract).
    h2 = jnp.dot(w2_ref[...], h1.astype(jnp.bfloat16),
                 preferred_element_type=jnp.float32)
    h2 = jnp.maximum(h2 + b2_ref[...], 0.0)           # (H2, TILE_B) f32

    # Layer 3: N = 1 -> sublane reduce (XLU/VPU) + EUP sigmoid; scalar bias from SMEM.
    y = jnp.sum(w3c_ref[...] * h2, axis=0, keepdims=True) + b3_ref[0, 0]
    o_ref[...] = jax.nn.sigmoid(y)                    # (1, TILE_B) lane-dense store


def mlp_forward(x, params, tile_b=DEFAULT_TILE_B):
    """x: (B, 3) float32 -> (B, 1) float32, matching Net.forward."""
    (w1, b1), (w2, b2), (w3, b3) = params             # weights (out,in), biases (out,1)
    B, in_dim = x.shape
    h1_dim = w1.shape[0]
    h2_dim = w2.shape[0]
    out_dim = w3.shape[0]                             # 1

    # --- tile-size selection ---------------------------------------------------
    # 1) Force lane alignment (the (8,128) rule on the xT/out blocks).
    tile_b = max(128, _round_up(int(tile_b), 128))
    # 2) Never larger than the 128-padded batch.
    b_pad128 = _round_up(max(B, 1), 128)
    tile_b = min(tile_b, b_pad128)
    # 3) Guarantee >= 2 grid steps when possible so v7x can use both TensorCores.
    if b_pad128 >= 2 * 128:
        tile_b = min(tile_b, _round_up(pl.cdiv(b_pad128, 2), 128))
    b_pad = _round_up(B, tile_b)

    # --- host-side layout prep (single fused pad, no zeros+update pass) --------
    xT = jnp.pad(x.T.astype(jnp.float32), ((0, 0), (0, b_pad - B)))
    w2_bf16 = w2.astype(jnp.bfloat16)                 # deliberate bf16 MXU operand
    w3c = w3.T                                        # (H2, 1) column for the reduce

    cost = pl.CostEstimate(
        flops=2 * B * (in_dim * h1_dim + h1_dim * h2_dim + h2_dim * out_dim),
        transcendentals=B * out_dim,                  # sigmoid
        bytes_accessed=(x.size + B * out_dim) * 4
        + (w1.size + b1.size + b2.size + w3.size + b3.size) * 4 + w2.size * 2,
    )

    out_t = pl.pallas_call(
        mlp_kernel,
        out_shape=jax.ShapeDtypeStruct((out_dim, b_pad), jnp.float32),
        grid=(b_pad // tile_b,),
        in_specs=[
            pl.BlockSpec((in_dim, tile_b), lambda i: (0, i)),   # x^T batch tile
            pl.BlockSpec((h1_dim, in_dim), lambda i: (0, 0)),   # W1 (VMEM resident)
            pl.BlockSpec((h1_dim, 1), lambda i: (0, 0)),        # b1
            pl.BlockSpec((h2_dim, h1_dim), lambda i: (0, 0)),   # W2 bf16 (VMEM resident)
            pl.BlockSpec((h2_dim, 1), lambda i: (0, 0)),        # b2
            pl.BlockSpec((h2_dim, out_dim), lambda i: (0, 0)),  # W3^T column
            pl.BlockSpec(memory_space=pltpu.MemorySpace.SMEM),  # b3 scalar
        ],
        out_specs=pl.BlockSpec((out_dim, tile_b), lambda i: (0, i)),
        compiler_params=pltpu.CompilerParams(
            dimension_semantics=("parallel",),
            vmem_limit_bytes=VMEM_LIMIT_BYTES),
        cost_estimate=cost,
    )(xT, w1, b1, w2_bf16, b2, w3c, b3)

    return out_t[:, :B].T                             # (B, 1)


def init_params(key, structure):
    """nn.Linear-style init: U(-1/sqrt(fan_in), +1/sqrt(fan_in)).

    Weights in PyTorch (out_features, in_features) layout; biases stored as
    (out_features, 1) columns so they lane-broadcast inside the kernel.
    """
    params = []
    for i in range(len(structure) - 1):
        fan_in, fan_out = structure[i], structure[i + 1]
        key, kw, kb = jax.random.split(key, 3)
        bound = 1.0 / (fan_in ** 0.5)
        w = jax.random.uniform(kw, (fan_out, fan_in), jnp.float32, -bound, bound)
        b = jax.random.uniform(kb, (fan_out, 1), jnp.float32, -bound, bound)
        params.append((w, b))
    return params


def reference_forward(x, params):
    """Pure-JAX reference mirroring the kernel's numerics exactly:
    f32 elementwise layer 1, bf16-operand / f32-accumulate layer 2, f32 layer 3."""
    (w1, b1), (w2, b2), (w3, b3) = params
    h1 = x[:, 0:1] * w1[:, 0][None, :]
    for k in range(1, w1.shape[1]):
        h1 = h1 + x[:, k:k + 1] * w1[:, k][None, :]
    h1 = jnp.maximum(h1 + b1[:, 0][None, :], 0.0)
    h2 = jnp.dot(h1.astype(jnp.bfloat16), w2.T.astype(jnp.bfloat16),
                 preferred_element_type=jnp.float32)
    h2 = jnp.maximum(h2 + b2[:, 0][None, :], 0.0)
    z = jnp.sum(h2 * w3[0][None, :], axis=-1, keepdims=True) + b3[0, 0]
    return jax.nn.sigmoid(z)


def reference_forward_f32(x, params):
    """Full-precision reference (loose-tolerance sanity check of the bf16 layer)."""
    (w1, b1), (w2, b2), (w3, b3) = params
    h = x
    h = jnp.maximum(h @ w1.T + b1[:, 0][None, :], 0.0)
    h = jnp.maximum(h @ w2.T + b2[:, 0][None, :], 0.0)
    return jax.nn.sigmoid(h @ w3.T + b3[:, 0][None, :])


if __name__ == "__main__":
    key = jax.random.PRNGKey(0)
    key, kx = jax.random.split(key)

    batch = 8
    x = jax.random.normal(kx, (batch, STRUCTURE[0]), jnp.float32)
    params = init_params(key, STRUCTURE)

    out = jax.block_until_ready(mlp_forward(x, params))
    ref = reference_forward(x, params)
    ref32 = reference_forward_f32(x, params)
    assert out.shape == (batch, STRUCTURE[-1])
    assert jnp.allclose(out, ref, atol=2e-4, rtol=1e-4), float(jnp.max(jnp.abs(out - ref)))
    assert jnp.allclose(out, ref32, atol=5e-2), float(jnp.max(jnp.abs(out - ref32)))

    # Multi-step grid + ragged tail (B not a multiple of tile_b).
    key, kx2 = jax.random.split(key)
    x2 = jax.random.normal(kx2, (1000, STRUCTURE[0]), jnp.float32)
    out2 = jax.block_until_ready(mlp_forward(x2, params, tile_b=256))
    ref2 = reference_forward(x2, params)
    assert out2.shape == (1000, 1)
    assert jnp.allclose(out2, ref2, atol=2e-4, rtol=1e-4), float(jnp.max(jnp.abs(out2 - ref2)))

    # Non-128-aligned user tile_b (gets rounded up to 256) — robustness path.
    out3 = jax.block_until_ready(mlp_forward(x2, params, tile_b=200))
    assert jnp.allclose(out3, ref2, atol=2e-4, rtol=1e-4), float(jnp.max(jnp.abs(out3 - ref2)))

    print("KERNEL_OK")
</pallas_src>

<mosaic_0001>
module attributes {stable_mosaic.version = 11 : i64} {
  func.func @mlp_kernel(%arg0: i32, %arg1: memref<3x128xf32, #tpu.memory_space<vmem>>, %arg2: memref<50x3xf32, #tpu.memory_space<vmem>>, %arg3: memref<50x1xf32, #tpu.memory_space<vmem>>, %arg4: memref<50x50xbf16, #tpu.memory_space<vmem>>, %arg5: memref<50x1xf32, #tpu.memory_space<vmem>>, %arg6: memref<50x1xf32, #tpu.memory_space<vmem>>, %arg7: memref<1x1xf32, #tpu.memory_space<smem>>, %arg8: memref<1x128xf32, #tpu.memory_space<vmem>>) attributes {dimension_semantics = [#tpu.dimension_semantics<parallel>], iteration_bounds = array<i64: 1>, scalar_prefetch = 0 : i64, scratch_operands = 0 : i64, tpu.core_type = #tpu.core_type<tc>, window_params = [{transform_indices = @transform_0, window_bounds = array<i64: 3, 128>}, {pipeline_mode = #tpu.pipeline_mode<synchronous>, transform_indices = @transform_1, window_bounds = array<i64: 50, 3>}, {pipeline_mode = #tpu.pipeline_mode<synchronous>, transform_indices = @transform_2, window_bounds = array<i64: 50, 1>}, {pipeline_mode = #tpu.pipeline_mode<synchronous>, transform_indices = @transform_3, window_bounds = array<i64: 50, 50>}, {pipeline_mode = #tpu.pipeline_mode<synchronous>, transform_indices = @transform_4, window_bounds = array<i64: 50, 1>}, {pipeline_mode = #tpu.pipeline_mode<synchronous>, transform_indices = @transform_5, window_bounds = array<i64: 50, 1>}, {transform_indices = @transform_6, window_bounds = array<i64: 1, 1>}, {transform_indices = @transform_7, window_bounds = array<i64: 1, 128>}]} {
    %c0 = arith.constant 0 : index
    %c0_0 = arith.constant 0 : index
    %0 = vector.load %arg1[%c0, %c0_0] : memref<3x128xf32, #tpu.memory_space<vmem>>, vector<3x128xf32>
    %c0_1 = arith.constant 0 : index
    %c0_2 = arith.constant 0 : index
    %1 = vector.load %arg2[%c0_1, %c0_2] : memref<50x3xf32, #tpu.memory_space<vmem>>, vector<50x3xf32>
    %2 = vector.extract_strided_slice %1 {offsets = [0, 0], sizes = [50, 1], strides = [1, 1]} : vector<50x3xf32> to vector<50x1xf32>
    %3 = vector.extract_strided_slice %0 {offsets = [0, 0], sizes = [1, 128], strides = [1, 1]} : vector<3x128xf32> to vector<1x128xf32>
    %4 = vector.broadcast %2 : vector<50x1xf32> to vector<50x128xf32>
    %5 = vector.broadcast %3 : vector<1x128xf32> to vector<50x128xf32>
    %6 = arith.mulf %4, %5 : vector<50x128xf32>
    %7 = vector.extract_strided_slice %1 {offsets = [0, 1], sizes = [50, 1], strides = [1, 1]} : vector<50x3xf32> to vector<50x1xf32>
    %8 = vector.extract_strided_slice %0 {offsets = [1, 0], sizes = [1, 128], strides = [1, 1]} : vector<3x128xf32> to vector<1x128xf32>
    %9 = vector.broadcast %7 : vector<50x1xf32> to vector<50x128xf32>
    %10 = vector.broadcast %8 : vector<1x128xf32> to vector<50x128xf32>
    %11 = arith.mulf %9, %10 : vector<50x128xf32>
    %12 = arith.addf %6, %11 : vector<50x128xf32>
    %13 = vector.extract_strided_slice %1 {offsets = [0, 2], sizes = [50, 1], strides = [1, 1]} : vector<50x3xf32> to vector<50x1xf32>
    %14 = vector.extract_strided_slice %0 {offsets = [2, 0], sizes = [1, 128], strides = [1, 1]} : vector<3x128xf32> to vector<1x128xf32>
    %15 = vector.broadcast %13 : vector<50x1xf32> to vector<50x128xf32>
    %16 = vector.broadcast %14 : vector<1x128xf32> to vector<50x128xf32>
    %17 = arith.mulf %15, %16 : vector<50x128xf32>
    %18 = arith.addf %12, %17 : vector<50x128xf32>
    %c0_3 = arith.constant 0 : index
    %c0_4 = arith.constant 0 : index
    %19 = vector.load %arg3[%c0_3, %c0_4] : memref<50x1xf32, #tpu.memory_space<vmem>>, vector<50x1xf32>
    %20 = vector.broadcast %19 : vector<50x1xf32> to vector<50x128xf32>
    %21 = arith.addf %18, %20 : vector<50x128xf32>
    %cst = arith.constant 0.000000e+00 : f32
    %22 = vector.broadcast %cst : f32 to vector<50x128xf32>
    %23 = arith.maximumf %21, %22 : vector<50x128xf32>
    %c0_5 = arith.constant 0 : index
    %c0_6 = arith.constant 0 : index
    %24 = vector.load %arg4[%c0_5, %c0_6] : memref<50x50xbf16, #tpu.memory_space<vmem>>, vector<50x50xbf16>
    %25 = arith.truncf %23 : vector<50x128xf32> to vector<50x128xbf16>
    %cst_7 = arith.constant dense<0.000000e+00> : vector<50x128xf32>
    %26 = tpu.matmul %24, %25, %cst_7 {dimension_numbers = #tpu.dot_dimension_numbers<[1], [0], [0], [1], [0, 0, 1, 1], [], []>} : vector<50x50xbf16>, vector<50x128xbf16>, vector<50x128xf32> -> vector<50x128xf32>
    %c0_8 = arith.constant 0 : index
    %c0_9 = arith.constant 0 : index
    %27 = vector.load %arg5[%c0_8, %c0_9] : memref<50x1xf32, #tpu.memory_space<vmem>>, vector<50x1xf32>
    %28 = vector.broadcast %27 : vector<50x1xf32> to vector<50x128xf32>
    %29 = arith.addf %26, %28 : vector<50x128xf32>
    %cst_10 = arith.constant 0.000000e+00 : f32
    %30 = vector.broadcast %cst_10 : f32 to vector<50x128xf32>
    %31 = arith.maximumf %29, %30 : vector<50x128xf32>
    %c0_11 = arith.constant 0 : index
    %c0_12 = arith.constant 0 : index
    %32 = vector.load %arg6[%c0_11, %c0_12] : memref<50x1xf32, #tpu.memory_space<vmem>>, vector<50x1xf32>
    %33 = vector.broadcast %32 : vector<50x1xf32> to vector<50x128xf32>
    %34 = arith.mulf %33, %31 : vector<50x128xf32>
    %cst_13 = arith.constant dense<0.000000e+00> : vector<128xf32>
    %35 = vector.multi_reduction <add>, %34, %cst_13 [0] : vector<50x128xf32> to vector<128xf32>
    %36 = vector.shape_cast %35 : vector<128xf32> to vector<1x128xf32>
    %c0_14 = arith.constant 0 : index
    %c0_15 = arith.constant 0 : index
    %37 = memref.load %arg7[%c0_14, %c0_15] : memref<1x1xf32, #tpu.memory_space<smem>>
    %38 = vector.broadcast %37 : f32 to vector<1x128xf32>
    %39 = arith.addf %36, %38 : vector<1x128xf32>
    %40 = arith.negf %39 : vector<1x128xf32>
    %41 = math.exp %40 : vector<1x128xf32>
    %cst_16 = arith.constant 1.000000e+00 : f32
    %42 = vector.broadcast %cst_16 : f32 to vector<1x128xf32>
    %43 = arith.addf %42, %41 : vector<1x128xf32>
    %44 = arith.divf %42, %43 : vector<1x128xf32>
    %c0_17 = arith.constant 0 : index
    %c0_18 = arith.constant 0 : index
    %45 = vector.load %arg8[%c0_17, %c0_18] : memref<1x128xf32, #tpu.memory_space<vmem>>, vector<1x128xf32>
    tpu.vector_store %arg8[%c0_17, %c0_18], %44 {strides = array<i32>} : memref<1x128xf32, #tpu.memory_space<vmem>>, vector<1x128xf32>,
    return
  }
  func.func @transform_0(%arg0: i32) -> (i32, i32) {
    %c0_i32 = arith.constant 0 : i32
    %c0_i32_0 = arith.constant 0 : i32
    return %c0_i32, %arg0 : i32, i32
  }
  func.func @transform_1(%arg0: i32) -> (i32, i32) {
    %c0_i32 = arith.constant 0 : i32
    %c0_i32_0 = arith.constant 0 : i32
    %c0_i32_1 = arith.constant 0 : i32
    return %c0_i32, %c0_i32_0 : i32, i32
  }
  func.func @transform_2(%arg0: i32) -> (i32, i32) {
    %c0_i32 = arith.constant 0 : i32
    %c0_i32_0 = arith.constant 0 : i32
    %c0_i32_1 = arith.constant 0 : i32
    return %c0_i32, %c0_i32_0 : i32, i32
  }
  func.func @transform_3(%arg0: i32) -> (i32, i32) {
    %c0_i32 = arith.constant 0 : i32
    %c0_i32_0 = arith.constant 0 : i32
    %c0_i32_1 = arith.constant 0 : i32
    return %c0_i32, %c0_i32_0 : i32, i32
  }
  func.func @transform_4(%arg0: i32) -> (i32, i32) {
    %c0_i32 = arith.constant 0 : i32
    %c0_i32_0 = arith.constant 0 : i32
    %c0_i32_1 = arith.constant 0 : i32
    return %c0_i32, %c0_i32_0 : i32, i32
  }
  func.func @transform_5(%arg0: i32) -> (i32, i32) {
    %c0_i32 = arith.constant 0 : i32
    %c0_i32_0 = arith.constant 0 : i32
    %c0_i32_1 = arith.constant 0 : i32
    return %c0_i32, %c0_i32_0 : i32, i32
  }
  func.func @transform_6(%arg0: i32) -> (i32, i32) {
    %c0_i32 = arith.constant 0 : i32
    %c0_i32_0 = arith.constant 0 : i32
    %c0_i32_1 = arith.constant 0 : i32
    return %c0_i32, %c0_i32_0 : i32, i32
  }
  func.func @transform_7(%arg0: i32) -> (i32, i32) {
    %c0_i32 = arith.constant 0 : i32
    %c0_i32_0 = arith.constant 0 : i32
    return %c0_i32, %arg0 : i32, i32
  }
}

</mosaic_0001>

<bundles_post_ra>
// kernel: tpu_custom_call.1
= control target key start
LH: loop header
LB: loop body
LE: loop exit
PB: predicated region body
PF: predicated region fallthrough
CT: control target
= control target key end

     0   :  { %v535_v2 = vmov 2   ;;  %v536_v3 = vmov 1   ;;  %v537_v4 = vmov 0   ;;  %s714_s0 = inlined_call_operand.vmem [shape: f32[3,128], index: 0, kind: input, shape index: {}]   ;;  %s715_s1 = inlined_call_operand.vmem [shape: f32[50,3], index: 1, kind: input, shape index: {}]   ;;  %s716_s2 = inlined_call_operand.vmem [shape: f32[50,1], index: 2, kind: input, shape index: {}]   ;;  %s717_s3 = inlined_call_operand.vmem [shape: bf16[50,50], index: 3, kind: input, shape index: {}]   ;;  %s718_s4 = inlined_call_operand.vmem [shape: f32[50,1], index: 4, kind: input, shape index: {}]   ;;  %s719_s5 = inlined_call_operand.vmem [shape: f32[50,1], index: 5, kind: input, shape index: {}]   ;;  %s720_s6 = inlined_call_operand.<no memory space> [shape: f32[1,1], index: 6, kind: input, shape index: {}]   ;;  %s721_s7 = inlined_call_operand.hbm [shape: f32[1,128], index: 7, kind: output, shape index: {}]  }
   0x1   :  { %v36_v0 = vld [vmem:[%s715_s1 + $0x30] sm:$0x3]  ;;  %v35_v1 = vld [vmem:[%s715_s1 + $0x28] sm:$0xff]  ;;  %484 = vset.pattern.permute.xlu1 %v535_v2  ;;  %483 = vset.pattern.permute.xlu0 %v536_v3 }
   0x2   :  { %486 = vset.pattern.permute.xlu2 %v537_v4  ;;  %148 = vperm.xlu1 %484, %v36_v0  }
   0x3   :  { %13 = vsyncpa [#allocation4], 0  ;;  %105 = vperm.xlu0 %483, %v36_v0   ;;  %64 = vperm.xlu2 %486, %v35_v1   ;;  %v33_v5 = vld [vmem:[%s715_s1 + $0x18] sm:$0xff]  ;;  %v34_v6 = vld [vmem:[%s715_s1 + $0x20] sm:$0xff]  ;;  %vm306_vm0 = vcmask 1040384   ;;  %vm293_vm1 = vcmask 408576  }
   0x4   :  { %v172_v7 = vld [vmem:[%s716_s2 + $0x30] sm:$0x3]  ;;  %v30_v8 = vld [vmem:[%s715_s1] sm:$0xff]  ;;  %v31_v10 = vld [vmem:[%s715_s1 + $0x8] sm:$0xff]  ;;  %vm399_vm2 = vcmask 1041408   ;;  %s538_s15 = smov [#allocation3]  }
   0x5   :  { %v32_v9 = vld [vmem:[%s715_s1 + $0x10] sm:$0xff]  ;;  %v171_v11 = vld [vmem:[%s716_s2 + $0x28] sm:$0xff]  ;;  %v170_v12 = vld [vmem:[%s716_s2 + $0x20] sm:$0xff]  ;;  %s436_s16 = sshll.u32 %s538_s15, 4  ;;  %s437_s16 = int_to_ptr.vmem [resolvable:$true] %s436_s16 }
   0x6   :  { %v169_v13 = vld [vmem:[%s716_s2 + $0x18] sm:$0xff]  ;;  %v168_v14 = vld [vmem:[%s716_s2 + $0x10] sm:$0xff]  ;;  %v167_v15 = vld [vmem:[%s716_s2 + $0x8] sm:$0xff] }
   0x7   :  { %v166_v16 = vld [vmem:[%s716_s2] sm:$0xff]  ;;  %v235_v17 = vld [vmem:[%s718_s4 + $0x10] sm:$0xff]  ;;  %v234_v18 = vld [vmem:[%s718_s4 + $0x8] sm:$0xff] }
   0x8   :  { %v345_v20 = vld [vmem:[%s719_s5] sm:$0xff]  ;;  %v236_v21 = vld [vmem:[%s718_s4 + $0x18] sm:$0xff]  ;;  %v347_v22 = vld [vmem:[%s719_s5 + $0x10] sm:$0xff] }
   0x9   :  { %v237_v24 = vld [vmem:[%s718_s4 + $0x20] sm:$0xff]  ;;  %v239_v27 = vld [vmem:[%s718_s4 + $0x30] sm:$0x3]  ;;  %v348_v28 = vld [vmem:[%s719_s5 + $0x18] sm:$0xff] }
   0xa   :  { %485 = vset.pattern.permute.xlu1 %v537_v4  ;;  %v351_v32 = vld [vmem:[%s719_s5 + $0x30] sm:$0x3]  ;;  %v350_v33 = vld [vmem:[%s719_s5 + $0x28] sm:$0xff]  ;;  %v29_v34 = vld [vmem:[%s714_s0] sm:$0x7] }
   0xb   :  { %487 = vset.pattern.permute.xlu2 %v536_v3  ;;  %93 = vperm.xlu0 %483, %v33_v5   ;;  %v656_v35 = vperm.slane %v29_v34, 1  ;;  %v658_v37 = vperm.slane %v29_v34, 0  ;;  %v660_v38 = vperm.slane %v29_v34, 2  ;;  %v233_v61 = vld [vmem:[%s718_s4] sm:$0xff] }
   0xc   :  { %97 = vperm.xlu2 %487, %v34_v6   ;;  %59 = vperm.xlu1 %485, %v34_v6  }
  0x13   :  { %493 = vset.pattern.permute.xlu0 %v537_v4 }
  0x14   :  { %489 = vset.pattern.permute.xlu2 %v537_v4  ;;  %488 = vset.pattern.permute.xlu1 %v536_v3 }
  0x15   :  { %69 = vperm.xlu0 %493, %v36_v0   ;;  %205 = vperm.xlu2 %489, %v172_v7  }
  0x16   :  { %101 = vperm.xlu1 %488, %v35_v1  }
  0x1d   :  { %39 = vperm.xlu0 %493, %v30_v8   ;;  %49 = vperm.xlu2 %489, %v32_v9  }
  0x1e   :  { %490 = vset.pattern.permute.xlu1 %v535_v2 }
  0x1f   :  { %144 = vperm.xlu1 %490, %v35_v1  }
  0x25   :  { %498 = vset.pattern.permute.xlu0 %v535_v2  ;;  %492 = vset.pattern.permute.xlu2 %v536_v3 }
  0x26   :  { %140 = vperm.xlu0 %498, %v34_v6   ;;  %89 = vperm.xlu2 %492, %v32_v9   ;;  %v346_v6 = vld [vmem:[%s719_s5 + $0x8] sm:$0xff] }
  0x27   :  { %491 = vset.pattern.permute.xlu1 %v537_v4 }
  0x28   :  { %54 = vperm.xlu1 %491, %v33_v5  }
  0x2e   :  { %495 = vset.pattern.permute.xlu2 %v535_v2  ;;  %128 = vperm.xlu0 %498, %v31_v10  }
  0x2f   :  { %136 = vperm.xlu2 %495, %v33_v5  }
  0x30   :  { %494 = vset.pattern.permute.xlu1 %v535_v2 }
  0x31   :  { %132 = vperm.xlu1 %494, %v32_v9  }
  0x36   :  { %504 = vset.pattern.permute.xlu0 %v537_v4 }
  0x37   :  { %497 = vset.pattern.permute.xlu2 %v537_v4  ;;  %242 = vperm.xlu0 %504, %v233_v61  }
  0x38   :  { %200 = vperm.xlu2 %497, %v171_v11  }
  0x39   :  { %496 = vset.pattern.permute.xlu1 %v537_v4 }
  0x3a   :  { %195 = vperm.xlu1 %496, %v170_v12  }
  0x3f   :  { %359 = vperm.xlu0 %504, %v346_v6  }
  0x40   :  { %499 = vset.pattern.permute.xlu2 %v536_v3 }
  0x41   :  { %81 = vperm.xlu2 %499, %v30_v8  }
  0x42   :  { %44 = vperm.xlu1 %496, %v31_v10  }
  0x49   :  { %501 = vset.pattern.permute.xlu2 %v535_v2 }
  0x4a   :  { %500 = vset.pattern.permute.xlu1 %v536_v3  ;;  %124 = vperm.xlu2 %501, %v30_v8  }
  0x4b   :  { %85 = vperm.xlu1 %500, %v31_v10  }
  0x52   :  { %503 = vset.pattern.permute.xlu2 %v537_v4 }
  0x53   :  { %502 = vset.pattern.permute.xlu1 %v537_v4  ;;  %190 = vperm.xlu2 %503, %v169_v13   ;;  %v238_v13 = vld [vmem:[%s718_s4 + $0x28] sm:$0xff] }
  0x54   :  { %185 = vperm.xlu1 %502, %v168_v14   ;;  %267 = vperm.xlu0 %504, %v238_v13  }
  0x5b   :  { %180 = vperm.xlu2 %503, %v167_v15  }
  0x5c   :  { %175 = vperm.xlu1 %502, %v166_v16   ;;  %v349_v16 = vld [vmem:[%s719_s5 + $0x20] sm:$0xff] }
  0x5d   :  { %v65_v19 = vpop.permute.xlu2 %64  ;;  %374 = vperm.xlu0 %504, %v349_v16  }
  0x5e   :  { %v78_v56 = vmul.f32 %v658_v37, %v65_v19 }
  0x63   :  { %252 = vperm.xlu2 %503, %v235_v17  }
  0x64   :  { %247 = vperm.xlu1 %502, %v234_v18  }
  0x66   :  { %v98_v23 = vpop.permute.xlu2 %97 }
  0x67   :  { %v113_v62 = vmul.f32 %v656_v35, %v98_v23 }
  0x6b   :  { %354 = vperm.xlu2 %503, %v345_v20  }
  0x6c   :  { %257 = vperm.xlu1 %502, %v236_v21  }
  0x6f   :  { %v206_v29 = vpop.permute.xlu2 %205 }
  0x73   :  { %364 = vperm.xlu2 %503, %v347_v22  }
  0x74   :  { %262 = vperm.xlu1 %502, %v237_v24   ;;  %v149_v25 = vpop.permute.xlu1 %148 }
  0x75   :  { %v106_v26 = vpop.permute.xlu0 %105  ;;  %v158_v43 = vmul.f32 %v660_v38, %v149_v25 }
  0x76   :  { %v115_v39 = vmul.f32 %v656_v35, %v106_v26 }
  0x77   :  { %v50_v36 = vpop.permute.xlu2 %49 }
  0x78   :  { %v75_v20 = vmul.f32 %v658_v37, %v50_v36 }
  0x7b   :  { %272 = vperm.xlu2 %503, %v239_v27  }
  0x7c   :  { %369 = vperm.xlu1 %502, %v348_v28  }
  0x7d   :  { %v645_v30 = vpop.permute.xlu0 %93 }
  0x7e   :  { %v60_v31 = vpop.permute.xlu1 %59  ;;  %v112_v17 = vmul.f32 %v656_v35, %v645_v30 }
  0x7f   :  { %v77_v63 = vmul.f32 %v658_v37, %v60_v31 }
  0x80   :  { %v90_v47 = vpop.permute.xlu2 %89 }
  0x81   :  { %v120_v3 = vadd.f32 %v113_v62, %v77_v63  ;;  %v111_v21 = vmul.f32 %v656_v35, %v90_v47 }
  0x83   :  { %384 = vperm.xlu2 %503, %v351_v32   ;;  %v118_v28 = vadd.f32 %v111_v21, %v75_v20 }
  0x84   :  { %379 = vperm.xlu1 %502, %v350_v33  }
  0x87   :  { %v70_v40 = vpop.permute.xlu0 %69 }
  0x88   :  { %v79_v41 = vmul.f32 %v658_v37, %v70_v40  ;;  %v102_v42 = vpop.permute.xlu1 %101 }
  0x89   :  { %v137_v52 = vpop.permute.xlu2 %136  ;;  %v114_v55 = vmul.f32 %v656_v35, %v102_v42 }
  0x8a   :  { %v122_v44 = vadd.f32 %v115_v39, %v79_v41  ;;  %v155_v22 = vmul.f32 %v660_v38, %v137_v52 }
  0x8b   :  { %v121_v0 = vadd.f32 %v114_v55, %v78_v56  ;;  %v464_v55 = vld [vmem:[%s717_s3] sm:$0xff]  ;;  %v465_v56 = vld [vmem:[%s717_s3 + $0x8] sm:$0xff] }
  0x8c   :  { %v165_v45 = vadd.f32 %v158_v43, %v122_v44 }
  0x8e   :  { %v214_v46 = vadd.f32 %v206_v29, %v165_v45 }
  0x8f   :  { %v40_v53 = vpop.permute.xlu0 %39 }
  0x90   :  { %v221_v48 = vmax.f32 %v214_v46, 0.0  ;;  %v73_v31 = vmul.f32 %v658_v37, %v40_v53 }
  0x91   :  { %v145_v49 = vpop.permute.xlu1 %144 }
  0x92   :  { %v232_v50 = vpack.c.bf16 %v221_v48, %v221_v48  ;;  %v157_v57 = vmul.f32 %v660_v38, %v145_v49  ;;  %v201_v59 = vpop.permute.xlu2 %200 }
  0x94   :  { %v308_v51 = vsel %vm306_vm0, %v232_v50, 0  ;;  %v164_v1 = vadd.f32 %v157_v57, %v121_v0  ;;  %v228_v50 = vld [vmem:[%s717_s3 + $0x18] sm:$0x1]  ;;  %v466_v57 = vld [vmem:[%s717_s3 + $0x10] sm:$0xff] }
  0x95   :  { %314 = vmatpush.bf16.msra.mxu0 %v308_v51  ;;  %467 = vmatpush.bf16.msra.mxu1 %v308_v51 }
  0x96   :  { %468 = vmatpush.bf16.msra.mxu2 %v308_v51  ;;  %469 = vmatpush.bf16.msra.mxu3 %v308_v51  ;;  %v213_v4 = vadd.f32 %v201_v59, %v164_v1 }
  0x98   :  { %v141_v60 = vpop.permute.xlu0 %140  ;;  %v220_v10 = vmax.f32 %v213_v4, 0.0 }
  0x99   :  { %v156_v2 = vmul.f32 %v660_v38, %v141_v60 }
  0x9a   :  { %v55_v54 = vpop.permute.xlu1 %54 }
  0x9b   :  { %v163_v5 = vadd.f32 %v156_v2, %v120_v3  ;;  %v82_v9 = vpop.permute.xlu2 %81  ;;  %v76_v18 = vmul.f32 %v658_v37, %v55_v54 }
  0x9c   :  { %v109_v32 = vmul.f32 %v656_v35, %v82_v9 }
  0x9d   :  { %v119_v23 = vadd.f32 %v112_v17, %v76_v18 }
  0x9e   :  { %v116_v42 = vadd.f32 %v109_v32, %v73_v31 }
  0x9f   :  { %v162_v29 = vadd.f32 %v155_v22, %v119_v23 }
  0xa0   :  { %v129_v27 = vpop.permute.xlu0 %128 }
  0xa1   :  { %v153_v36 = vmul.f32 %v660_v38, %v129_v27 }
  0xa3   :  { %v133_v58 = vpop.permute.xlu1 %132 }
  0xa4   :  { %v125_v15 = vpop.permute.xlu2 %124  ;;  %v154_v24 = vmul.f32 %v660_v38, %v133_v58 }
  0xa5   :  { %v152_v43 = vmul.f32 %v660_v38, %v125_v15  ;;  %v288_v38 = vunpack.c.l.b16 %v228_v50 }
  0xa6   :  { %v161_v39 = vadd.f32 %v154_v24, %v118_v28 }
  0xa7   :  { %v292_v58 = vpack.c.b16 %v288_v38, %v288_v38 }
  0xa9   :  { %v243_v61 = vpop.permute.xlu0 %242 }
  0xac   :  { %v196_v7 = vpop.permute.xlu1 %195 }
  0xad   :  { %v212_v8 = vadd.f32 %v196_v7, %v163_v5  ;;  %v191_v26 = vpop.permute.xlu2 %190 }
  0xae   :  { %v211_v33 = vadd.f32 %v191_v26, %v162_v29 }
  0xaf   :  { %v219_v11 = vmax.f32 %v212_v8, 0.0 }
  0xb0   :  { %v218_v44 = vmax.f32 %v211_v33, 0.0 }
  0xb1   :  { %v231_v12 = vpack.c.bf16 %v220_v10, %v219_v11  ;;  %v360_v0 = vpop.permute.xlu0 %359 }
  0xb3   :  { %315 = vmatpush.bf16.msra.mxu0 %v231_v12  ;;  %470 = vmatpush.bf16.msra.mxu1 %v231_v12 }
  0xb4   :  { %471 = vmatpush.bf16.msra.mxu2 %v231_v12  ;;  %472 = vmatpush.bf16.msra.mxu3 %v231_v12  ;;  %v45_v14 = vpop.permute.xlu1 %44 }
  0xb5   :  { %v74_v30 = vmul.f32 %v658_v37, %v45_v14  ;;  %v181_v48 = vpop.permute.xlu2 %180  ;;  %v159_v37 = vadd.f32 %v152_v43, %v116_v42 }
  0xbd   :  { %v86_v19 = vpop.permute.xlu1 %85  ;;  %v253_v59 = vpop.permute.xlu2 %252 }
  0xbe   :  { %v110_v25 = vmul.f32 %v656_v35, %v86_v19 }
  0xc0   :  { %v117_v34 = vadd.f32 %v110_v25, %v74_v30 }
  0xc2   :  { %v160_v45 = vadd.f32 %v153_v36, %v117_v34 }
  0xc4   :  { %v209_v49 = vadd.f32 %v181_v48, %v160_v45 }
  0xc5   :  { %v355_v62 = vpop.permute.xlu2 %354 }
  0xc6   :  { %v186_v40 = vpop.permute.xlu1 %185  ;;  %v216_v53 = vmax.f32 %v209_v49, 0.0  ;;  %v268_v6 = vpop.permute.xlu0 %267 }
  0xc7   :  { %v210_v41 = vadd.f32 %v186_v40, %v161_v39 }
  0xc9   :  { %v217_v46 = vmax.f32 %v210_v41, 0.0 }
  0xcb   :  { %v230_v47 = vpack.c.bf16 %v218_v44, %v217_v46 }
  0xcd   :  { %316 = vmatpush.bf16.msra.mxu0 %v230_v47  ;;  %473 = vmatpush.bf16.msra.mxu1 %v230_v47  ;;  %v365_v1 = vpop.permute.xlu2 %364 }
  0xce   :  { %474 = vmatpush.bf16.msra.mxu2 %v230_v47  ;;  %475 = vmatpush.bf16.msra.mxu3 %v230_v47  ;;  %v176_v35 = vpop.permute.xlu1 %175 }
  0xcf   :  { %v208_v51 = vadd.f32 %v176_v35, %v159_v37  ;;  %v375_v33 = vpop.permute.xlu0 %374 }
  0xd1   :  { %v215_v52 = vmax.f32 %v208_v51, 0.0  ;;  %v409_v51 = vstv %s720_s6  ;;  %s438_s6 = sshll.u32 %s721_s7, 4  ;;  %s439_s6 = int_to_ptr.hbm [resolvable:$true] %s438_s6 }
  0xd3   :  { %v229_v54 = vpack.c.bf16 %v216_v53, %v215_v52 }
  0xd5   :  { %317 = vmatpush.bf16.msra.mxu0 %v229_v54  ;;  %476 = vmatpush.bf16.msra.mxu1 %v229_v54  ;;  %v273_v12 = vpop.permute.xlu2 %272 }
  0xd6   :  { %477 = vmatpush.bf16.msra.mxu2 %v229_v54  ;;  %478 = vmatpush.bf16.msra.mxu3 %v229_v54  ;;  %v248_v60 = vpop.permute.xlu1 %247 }
  0xd8   :  { %459 = vmatmul.msk.bf16.vlgmr.msra.gmra.mxu0 %vm293_vm1, %v464_v55  ;;  %460 = vmatmul.msk.bf16.vlgmr.msra.gmra.mxu1 %vm293_vm1, %v465_v56 }
  0xd9   :  { %461 = vmatmul.msk.bf16.vlgmr.msra.gmra.mxu2 %vm293_vm1, %v466_v57  ;;  %462 = vmatmul.msk.bf16.vlgmr.msra.gmra.mxu3 %vm293_vm1, %v292_v58 }
  0xdd   :  { %v385_v36 = vpop.permute.xlu2 %384 }
  0xde   :  { %v258_v63 = vpop.permute.xlu1 %257 }
  0xe6   :  { %v263_v2 = vpop.permute.xlu1 %262 }
  0xee   :  { %v370_v16 = vpop.permute.xlu1 %369 }
  0xf6   :  { %v380_v41 = vpop.permute.xlu1 %379 }
 0x155   :  { %v319_v3 = vpop.f32.mrf.mxu0  ;;  %v324_v4 = vpop.f32.mrf.mxu1 }
 0x156   :  { %v320_v5 = vadd.f32 %v319_v3, %v243_v61  ;;  %v325_v7 = vadd.f32 %v324_v4, %v253_v59 }
 0x158   :  { %v338_v13 = vmax.f32 %v320_v5, 0.0  ;;  %v340_v17 = vmax.f32 %v325_v7, 0.0 }
 0x15a   :  { %v387_v21 = vmul.f32 %v355_v62, %v338_v13  ;;  %v389_v24 = vmul.f32 %v365_v1, %v340_v17 }
 0x15c   :  { %v329_v8 = vpop.f32.mrf.mxu2  ;;  %v334_v9 = vpop.f32.mrf.mxu3 }
 0x15d   :  { %v321_v10 = vpop.f32.mrf.mxu0  ;;  %v326_v11 = vpop.f32.mrf.mxu1  ;;  %v330_v18 = vadd.f32 %v329_v8, %v263_v2  ;;  %v335_v20 = vadd.f32 %v334_v9, %v273_v12 }
 0x15e   :  { %v322_v14 = vadd.f32 %v321_v10, %v248_v60  ;;  %v327_v15 = vadd.f32 %v326_v11, %v258_v63 }
 0x15f   :  { %v342_v25 = vmax.f32 %v330_v18, 0.0  ;;  %v344_v29 = vmax.f32 %v335_v20, 0.0 }
 0x160   :  { %v339_v19 = vmax.f32 %v322_v14, 0.0  ;;  %v341_v23 = vmax.f32 %v327_v15, 0.0 }
 0x161   :  { %v391_v39 = vmul.f32 %v375_v33, %v342_v25  ;;  %v393_v42 = vmul.f32 %v385_v36, %v344_v29 }
 0x162   :  { %v388_v22 = vmul.f32 %v360_v0, %v339_v19  ;;  %v390_v31 = vmul.f32 %v370_v16, %v341_v23 }
 0x163   :  { %v400_v46 = vsel %vm399_vm2, %v393_v42, 0.0 }
 0x164   :  { %v394_v26 = vadd.f32 %v388_v22, %v387_v21  ;;  %v331_v27 = vpop.f32.mrf.mxu2  ;;  %v336_v28 = vpop.f32.mrf.mxu3 }
 0x165   :  { %v332_v30 = vadd.f32 %v331_v27, %v268_v6 }
 0x166   :  { %v395_v32 = vadd.f32 %v394_v26, %v389_v24 }
 0x167   :  { %v343_v34 = vmax.f32 %v332_v30, 0.0 }
 0x168   :  { %v396_v40 = vadd.f32 %v395_v32, %v390_v31 }
 0x169   :  { %v392_v43 = vmul.f32 %v380_v41, %v343_v34 }
 0x16a   :  { %v397_v44 = vadd.f32 %v396_v40, %v391_v39 }
 0x16c   :  { %v398_v45 = vadd.f32 %v397_v44, %v392_v43 }
 0x16e   :  { %v401_v47 = vadd.f32 %v400_v46, %v398_v45 }
 0x170   :  { %v402_v48 = vrot.slane %v401_v47, 4 }
 0x172   :  { %v403_v49 = vadd.f32 %v402_v48, %v401_v47 }
 0x174   :  { %v404_v37 = vrot.slane %v403_v49, 2 }
 0x176   :  { %v405_v35 = vadd.f32 %v404_v37, %v403_v49 }
 0x178   :  { %v406_v50 = vrot.slane %v405_v35, 1 }
 0x17a   :  { %v407_v52 = vadd.f32 %v406_v50, %v405_v35 }
 0x17c   :  { %v410_v53 = vadd.f32 %v409_v51, %v407_v52 }
 0x17e   :  { %v463_v38 = vmul.f32 -1.442695, %v410_v53 }
 0x180   :  { %505 = vpow2.f32 %v463_v38 }
 0x186   :  { %v506_v54 = vpop.eup %505 }
 0x187   :  { %v414_v55 = vadd.f32 1.0, %v506_v54 }
 0x189   :  { %507 = vrcp.f32 %v414_v55  ;;  %v426_v59 = vand.u32 2147483648, %v414_v55  ;;  %v424_v61 = vand.u32 2147483647, %v414_v55  ;;  %vm420_vm4 = vweird.f32 %v414_v55 }
 0x18b   :  { %v427_v63 = vor.u32 1.1754944e-38, %v426_v59  ;;  %vm425_vm6 = vcmp.eq.f32.partialorder %v424_v61, 8.507059e+37 }
 0x18f   :  { %v508_v56 = vpop.eup %507 }
 0x190   :  { %v416_v57 = vmul.f32 %v508_v56, %v414_v55  ;;  %vm421_vm3 = vweird.f32 %v508_v56 }
 0x191   :  { %vm422_vm5 = vmor %vm420_vm4, %vm421_vm3 }
 0x192   :  { %v417_v58 = vsub.f32 1.0, %v416_v57 }
 0x194   :  { %v418_v60 = vmul.f32 %v508_v56, %v417_v58 }
 0x196   :  { %v419_v62 = vadd.f32 %v508_v56, %v418_v60 }
 0x198   :  { %v423_v0 = vsel %vm422_vm5, %v508_v56, %v419_v62 }
 0x199   :  { %v428_v1 = vsel %vm425_vm6, %v427_v63, %v423_v0 }
 0x19a   :  { %430 = vst [vmem:[#allocation3] sm:$0x1] %v428_v1 }
 0x19b   :  { %441 = dma.vmem_to_hbm [thread:$0]  %s437_s16, 16, %s439_s6, [#allocation4]  }
 0x19c   :  { %533 = dma.done.wait [#allocation4], 16  }
 0x19d   :  { %534 = vsyncadd [#allocation4], 4294967280 }
 0x19e   :  { %446 = vsyncpa [#allocation4], 1 }

</bundles_post_ra>
